<compile_context>
chip_gen: v6e
topology: v6e:2x2x1
jax: 0.10.0
libtpu: 0.0.40
codegen_flags: <defaults>
</compile_context>

<pallas_src>
import functools

import jax
import jax.numpy as jnp
from jax import lax
from jax.experimental import pallas as pl
from jax.experimental.pallas import tpu as pltpu


def _fold_and_band(w_hwio, scale, W):
    """Fold BN scale into the (3,3,Ci,Co) conv weight and build the banded form.

    Returns band of shape (3, (W+2)*Ci, W*Co), bf16, with
        band[dh, (w+dw)*Ci + ci, w*Co + co] = scale[co] * w_hwio[dh, dw, ci, co]
    so that for the lane-dense padded slab (rows = padded h, lanes = j*Ci+ci):
        out[h, w*Co+co] = sum_dh ( slab[h+dh, :] @ band[dh] )[w*Co+co]
    """
    _, _, Ci, Co = w_hwio.shape
    wf = (w_hwio * scale.reshape(1, 1, 1, Co)).astype(jnp.float32)   # (3,3,Ci,Co)
    # Selector S[dw, j, w] = 1 iff padded column j == w + dw.
    j = jnp.arange(W + 2)[None, :, None]
    w = jnp.arange(W)[None, None, :]
    dw = jnp.arange(3)[:, None, None]
    S = (j == w + dw).astype(jnp.float32)                            # (3, W+2, W)
    band = jnp.einsum('djw,edio->ejiwo', S, wf)                      # (3, W+2, Ci, W, Co)
    return band.reshape(3, (W + 2) * Ci, W * Co).astype(jnp.bfloat16)


def _basic_block_kernel(xp_ref, w1_ref, b1_ref, w2_ref, b2_ref, out_ref,
                        mid_ref, *, H, W, C):
    """One grid step = one batch element, fully lane-dense.

    xp_ref : (H+2, (W+2)*C) f32      zero-padded input slab (also holds residual)
    w1_ref : (3, (W+2)*C, W*C) bf16  banded conv1 weights, BN1 scale folded in
    b1_ref : (1, W*C) f32            folded BN1 bias, tiled over w
    w2_ref : (3, (W+2)*C, W*C) bf16  banded conv2 weights, BN2 scale folded in
    b2_ref : (1, W*C) f32            folded BN2 bias, tiled over w
    out_ref: (H, W*C)                lane-dense output
    mid_ref: (H+2, (W+2)*C) f32      VMEM scratch, padded conv1 output
    """
    f32 = jnp.float32
    bf16 = jnp.bfloat16
    WC = W * C

    # ---- conv1 (+ folded BN1 scale): 3 banded matmuls, one per vertical tap.
    acc1 = jnp.zeros((H, WC), f32)
    for dh in range(3):
        acc1 = acc1 + jnp.dot(xp_ref[dh:dh + H, :].astype(bf16), w1_ref[dh],
                              preferred_element_type=f32)
    out1 = jnp.maximum(acc1 + b1_ref[...], 0.0)                 # BN1 bias + ReLU

    # ---- stage the lane-dense padded intermediate for conv2.
    # The halo must be zero; scratch is per-core under the parallel grid axis,
    # so it is re-zeroed every step (aligned stores over ~10 KB; trivial).
    mid_ref[...] = jnp.zeros(mid_ref.shape, f32)
    mid_ref[1:H + 1, C:C + WC] = out1

    # ---- conv2 (+ folded BN2 scale)
    acc2 = jnp.zeros((H, WC), f32)
    for dh in range(3):
        acc2 = acc2 + jnp.dot(mid_ref[dh:dh + H, :].astype(bf16), w2_ref[dh],
                              preferred_element_type=f32)

    # ---- BN2 bias, residual add (f32 interior of the padded input), final ReLU.
    residual = xp_ref[1:H + 1, C:C + WC]
    y = jnp.maximum(acc2 + b2_ref[...] + residual, 0.0)
    out_ref[...] = y.astype(out_ref.dtype)


def basic_block_pallas(x_nhwc, w1_hwio, w2_hwio, scale1, bias1, scale2, bias2):
    """x_nhwc: (N,H,W,Cin) f32; w*_hwio: (3,3,Ci,Co); scale/bias: folded eval-mode BN."""
    N, H, W, Cin = x_nhwc.shape
    Co = w1_hwio.shape[3]
    assert Cin == Co, "downsample=None requires inplanes == planes"
    assert w1_hwio.shape == (3, 3, Cin, Co) and w2_hwio.shape == (3, 3, Co, Co)
    C = Cin
    WC = W * C
    WP = (W + 2) * C

    # Host-side weight prep: fold BN scale, build banded matrices, bf16.
    w1b = _fold_and_band(w1_hwio, scale1, W)                    # (3, WP, WC) bf16
    w2b = _fold_and_band(w2_hwio, scale2, W)                    # (3, WP, WC) bf16
    b1 = jnp.tile(bias1.astype(jnp.float32), W).reshape(1, WC)  # bias per lane (w*Co+co)
    b2 = jnp.tile(bias2.astype(jnp.float32), W).reshape(1, WC)

    # Host-side zero pad (padding=1) and flatten to the lane-dense padded slab.
    xpad = jnp.pad(x_nhwc, ((0, 0), (1, 1), (1, 1), (0, 0)))
    xpad = xpad.reshape(N, H + 2, WP)

    kern = functools.partial(_basic_block_kernel, H=H, W=W, C=C)

    out_flat = pl.pallas_call(
        kern,
        out_shape=jax.ShapeDtypeStruct((N, H, WC), x_nhwc.dtype),
        grid=(N,),
        in_specs=[
            pl.BlockSpec((None, H + 2, WP), lambda n: (n, 0, 0)),   # padded input / residual
            pl.BlockSpec((3, WP, WC), lambda n: (0, 0, 0)),         # w1 banded (BN1-folded)
            pl.BlockSpec((1, WC), lambda n: (0, 0)),                # bn1 bias (tiled)
            pl.BlockSpec((3, WP, WC), lambda n: (0, 0, 0)),         # w2 banded (BN2-folded)
            pl.BlockSpec((1, WC), lambda n: (0, 0)),                # bn2 bias (tiled)
        ],
        out_specs=pl.BlockSpec((None, H, WC), lambda n: (n, 0, 0)),
        scratch_shapes=[
            pltpu.VMEM((H + 2, WP), jnp.float32),                   # padded intermediate
        ],
        compiler_params=pltpu.CompilerParams(
            dimension_semantics=("parallel",),
        ),
    )(xpad, w1b, b1, w2b, b2)

    return out_flat.reshape(N, H, W, Co)


def basic_block_reference(x_nhwc, w1_hwio, w2_hwio, scale1, bias1, scale2, bias2):
    """Pure-JAX reference with the same folded-bf16-weight / f32-accumulate math."""
    Co = w1_hwio.shape[3]
    dn = ('NHWC', 'HWIO', 'NHWC')
    w1 = (w1_hwio * scale1.reshape(1, 1, 1, Co)).astype(jnp.bfloat16)
    w2 = (w2_hwio * scale2.reshape(1, 1, 1, Co)).astype(jnp.bfloat16)
    y = lax.conv_general_dilated(x_nhwc.astype(jnp.bfloat16), w1, (1, 1), 'SAME',
                                 dimension_numbers=dn, preferred_element_type=jnp.float32)
    y = jnp.maximum(y + bias1.reshape(1, 1, 1, Co), 0.0)
    y = lax.conv_general_dilated(y.astype(jnp.bfloat16), w2, (1, 1), 'SAME',
                                 dimension_numbers=dn, preferred_element_type=jnp.float32)
    y = y + bias2.reshape(1, 1, 1, Co)
    return jnp.maximum(y + x_nhwc, 0.0)


def fold_bn(gamma, beta, running_mean, running_var, eps=1e-5):
    scale = gamma / jnp.sqrt(running_var + eps)
    bias = beta - running_mean * scale
    return scale, bias


if __name__ == "__main__":
    key = jax.random.PRNGKey(0)
    N, C, H, W = 2, 8, 16, 16          # inplanes == planes == 8, stride=1; W*C = 128
    ks = jax.random.split(key, 11)

    # Input in PyTorch NCHW convention, converted to kernel NHWC layout.
    x_nchw = jax.random.normal(ks[0], (N, C, H, W), jnp.float32)
    x_nhwc = jnp.transpose(x_nchw, (0, 2, 3, 1))

    # Conv weights, PyTorch shape (out, in, 3, 3), converted to HWIO.
    w1_oihw = jax.random.normal(ks[1], (C, C, 3, 3), jnp.float32) * 0.1
    w2_oihw = jax.random.normal(ks[2], (C, C, 3, 3), jnp.float32) * 0.1
    w1_hwio = jnp.transpose(w1_oihw, (2, 3, 1, 0))
    w2_hwio = jnp.transpose(w2_oihw, (2, 3, 1, 0))

    # BatchNorm parameters (eval-mode running stats + affine), deterministic.
    g1 = 0.5 + jax.random.uniform(ks[3], (C,), jnp.float32)
    be1 = 0.1 * jax.random.normal(ks[4], (C,), jnp.float32)
    m1 = 0.1 * jax.random.normal(ks[5], (C,), jnp.float32)
    v1 = 0.5 + jax.random.uniform(ks[6], (C,), jnp.float32)
    g2 = 0.5 + jax.random.uniform(ks[7], (C,), jnp.float32)
    be2 = 0.1 * jax.random.normal(ks[8], (C,), jnp.float32)
    m2 = 0.1 * jax.random.normal(ks[9], (C,), jnp.float32)
    v2 = 0.5 + jax.random.uniform(ks[10], (C,), jnp.float32)

    scale1, bias1 = fold_bn(g1, be1, m1, v1)
    scale2, bias2 = fold_bn(g2, be2, m2, v2)

    out = basic_block_pallas(x_nhwc, w1_hwio, w2_hwio, scale1, bias1, scale2, bias2)
    out = jax.block_until_ready(out)

    ref = basic_block_reference(x_nhwc, w1_hwio, w2_hwio, scale1, bias1, scale2, bias2)
    ref = jax.block_until_ready(ref)

    assert out.shape == (N, H, W, C)
    max_err = float(jnp.max(jnp.abs(out - ref)))
    assert max_err < 2e-2, f"max abs err = {max_err}"

    print("KERNEL_OK")
</pallas_src>

<mosaic_0001>
module attributes {stable_mosaic.version = 11 : i64} {
  func.func @_basic_block_kernel(%arg0: i32, %arg1: memref<1x18x144xf32, #tpu.memory_space<vmem>>, %arg2: memref<3x144x128xbf16, #tpu.memory_space<vmem>>, %arg3: memref<1x128xf32, #tpu.memory_space<vmem>>, %arg4: memref<3x144x128xbf16, #tpu.memory_space<vmem>>, %arg5: memref<1x128xf32, #tpu.memory_space<vmem>>, %arg6: memref<1x16x128xf32, #tpu.memory_space<vmem>>, %arg7: memref<18x144xf32, #tpu.memory_space<vmem>>) attributes {dimension_semantics = [#tpu.dimension_semantics<parallel>], iteration_bounds = array<i64: 2>, scalar_prefetch = 0 : i64, scratch_operands = 1 : i64, tpu.core_type = #tpu.core_type<tc>, window_params = [{transform_indices = @transform_0, window_bounds = array<i64: 1, 18, 144>}, {pipeline_mode = #tpu.pipeline_mode<synchronous>, transform_indices = @transform_1, window_bounds = array<i64: 3, 144, 128>}, {pipeline_mode = #tpu.pipeline_mode<synchronous>, transform_indices = @transform_2, window_bounds = array<i64: 1, 128>}, {pipeline_mode = #tpu.pipeline_mode<synchronous>, transform_indices = @transform_3, window_bounds = array<i64: 3, 144, 128>}, {pipeline_mode = #tpu.pipeline_mode<synchronous>, transform_indices = @transform_4, window_bounds = array<i64: 1, 128>}, {transform_indices = @transform_5, window_bounds = array<i64: 1, 16, 128>}]} {
    %cst = arith.constant 0.000000e+00 : f32
    %0 = vector.broadcast %cst : f32 to vector<16x128xf32>
    %c0 = arith.constant 0 : index
    %c0_0 = arith.constant 0 : index
    %c0_1 = arith.constant 0 : index
    %1 = vector.load %arg1[%c0, %c0_0, %c0_1] : memref<1x18x144xf32, #tpu.memory_space<vmem>>, vector<1x16x144xf32>
    %2 = vector.shape_cast %1 : vector<1x16x144xf32> to vector<16x144xf32>
    %3 = arith.truncf %2 : vector<16x144xf32> to vector<16x144xbf16>
    %c0_2 = arith.constant 0 : index
    %c0_3 = arith.constant 0 : index
    %c0_4 = arith.constant 0 : index
    %4 = vector.load %arg2[%c0_2, %c0_3, %c0_4] : memref<3x144x128xbf16, #tpu.memory_space<vmem>>, vector<1x144x128xbf16>
    %5 = vector.shape_cast %4 : vector<1x144x128xbf16> to vector<144x128xbf16>
    %cst_5 = arith.constant dense<0.000000e+00> : vector<16x128xf32>
    %6 = tpu.matmul %3, %5, %cst_5 {dimension_numbers = #tpu.dot_dimension_numbers<[1], [0], [0], [1], [0, 0, 1, 1], [], []>} : vector<16x144xbf16>, vector<144x128xbf16>, vector<16x128xf32> -> vector<16x128xf32>
    %7 = arith.addf %0, %6 : vector<16x128xf32>
    %c0_6 = arith.constant 0 : index
    %c1 = arith.constant 1 : index
    %c0_7 = arith.constant 0 : index
    %8 = vector.load %arg1[%c0_6, %c1, %c0_7] : memref<1x18x144xf32, #tpu.memory_space<vmem>>, vector<1x16x144xf32>
    %9 = vector.shape_cast %8 : vector<1x16x144xf32> to vector<16x144xf32>
    %10 = arith.truncf %9 : vector<16x144xf32> to vector<16x144xbf16>
    %c1_8 = arith.constant 1 : index
    %c0_9 = arith.constant 0 : index
    %c0_10 = arith.constant 0 : index
    %11 = vector.load %arg2[%c1_8, %c0_9, %c0_10] : memref<3x144x128xbf16, #tpu.memory_space<vmem>>, vector<1x144x128xbf16>
    %12 = vector.shape_cast %11 : vector<1x144x128xbf16> to vector<144x128xbf16>
    %cst_11 = arith.constant dense<0.000000e+00> : vector<16x128xf32>
    %13 = tpu.matmul %10, %12, %cst_11 {dimension_numbers = #tpu.dot_dimension_numbers<[1], [0], [0], [1], [0, 0, 1, 1], [], []>} : vector<16x144xbf16>, vector<144x128xbf16>, vector<16x128xf32> -> vector<16x128xf32>
    %14 = arith.addf %7, %13 : vector<16x128xf32>
    %c0_12 = arith.constant 0 : index
    %c2 = arith.constant 2 : index
    %c0_13 = arith.constant 0 : index
    %15 = vector.load %arg1[%c0_12, %c2, %c0_13] : memref<1x18x144xf32, #tpu.memory_space<vmem>>, vector<1x16x144xf32>
    %16 = vector.shape_cast %15 : vector<1x16x144xf32> to vector<16x144xf32>
    %17 = arith.truncf %16 : vector<16x144xf32> to vector<16x144xbf16>
    %c2_14 = arith.constant 2 : index
    %c0_15 = arith.constant 0 : index
    %c0_16 = arith.constant 0 : index
    %18 = vector.load %arg2[%c2_14, %c0_15, %c0_16] : memref<3x144x128xbf16, #tpu.memory_space<vmem>>, vector<1x144x128xbf16>
    %19 = vector.shape_cast %18 : vector<1x144x128xbf16> to vector<144x128xbf16>
    %cst_17 = arith.constant dense<0.000000e+00> : vector<16x128xf32>
    %20 = tpu.matmul %17, %19, %cst_17 {dimension_numbers = #tpu.dot_dimension_numbers<[1], [0], [0], [1], [0, 0, 1, 1], [], []>} : vector<16x144xbf16>, vector<144x128xbf16>, vector<16x128xf32> -> vector<16x128xf32>
    %21 = arith.addf %14, %20 : vector<16x128xf32>
    %c0_18 = arith.constant 0 : index
    %c0_19 = arith.constant 0 : index
    %22 = vector.load %arg3[%c0_18, %c0_19] : memref<1x128xf32, #tpu.memory_space<vmem>>, vector<1x128xf32>
    %23 = vector.broadcast %22 : vector<1x128xf32> to vector<16x128xf32>
    %24 = arith.addf %21, %23 : vector<16x128xf32>
    %cst_20 = arith.constant 0.000000e+00 : f32
    %25 = vector.broadcast %cst_20 : f32 to vector<16x128xf32>
    %26 = arith.maximumf %24, %25 : vector<16x128xf32>
    %cst_21 = arith.constant 0.000000e+00 : f32
    %27 = vector.broadcast %cst_21 : f32 to vector<18x144xf32>
    %c0_22 = arith.constant 0 : index
    %c0_23 = arith.constant 0 : index
    %28 = vector.load %arg7[%c0_22, %c0_23] : memref<18x144xf32, #tpu.memory_space<vmem>>, vector<18x144xf32>
    tpu.vector_store %arg7[%c0_22, %c0_23], %27 {strides = array<i32>} : memref<18x144xf32, #tpu.memory_space<vmem>>, vector<18x144xf32>,
    %c1_24 = arith.constant 1 : index
    %c8 = arith.constant 8 : index
    %29 = vector.load %arg7[%c1_24, %c8] : memref<18x144xf32, #tpu.memory_space<vmem>>, vector<16x128xf32>
    tpu.vector_store %arg7[%c1_24, %c8], %26 {strides = array<i32>} : memref<18x144xf32, #tpu.memory_space<vmem>>, vector<16x128xf32>,
    %cst_25 = arith.constant 0.000000e+00 : f32
    %30 = vector.broadcast %cst_25 : f32 to vector<16x128xf32>
    %c0_26 = arith.constant 0 : index
    %c0_27 = arith.constant 0 : index
    %31 = vector.load %arg7[%c0_26, %c0_27] : memref<18x144xf32, #tpu.memory_space<vmem>>, vector<16x144xf32>
    %32 = arith.truncf %31 : vector<16x144xf32> to vector<16x144xbf16>
    %c0_28 = arith.constant 0 : index
    %c0_29 = arith.constant 0 : index
    %c0_30 = arith.constant 0 : index
    %33 = vector.load %arg4[%c0_28, %c0_29, %c0_30] : memref<3x144x128xbf16, #tpu.memory_space<vmem>>, vector<1x144x128xbf16>
    %34 = vector.shape_cast %33 : vector<1x144x128xbf16> to vector<144x128xbf16>
    %cst_31 = arith.constant dense<0.000000e+00> : vector<16x128xf32>
    %35 = tpu.matmul %32, %34, %cst_31 {dimension_numbers = #tpu.dot_dimension_numbers<[1], [0], [0], [1], [0, 0, 1, 1], [], []>} : vector<16x144xbf16>, vector<144x128xbf16>, vector<16x128xf32> -> vector<16x128xf32>
    %36 = arith.addf %30, %35 : vector<16x128xf32>
    %c1_32 = arith.constant 1 : index
    %c0_33 = arith.constant 0 : index
    %37 = vector.load %arg7[%c1_32, %c0_33] : memref<18x144xf32, #tpu.memory_space<vmem>>, vector<16x144xf32>
    %38 = arith.truncf %37 : vector<16x144xf32> to vector<16x144xbf16>
    %c1_34 = arith.constant 1 : index
    %c0_35 = arith.constant 0 : index
    %c0_36 = arith.constant 0 : index
    %39 = vector.load %arg4[%c1_34, %c0_35, %c0_36] : memref<3x144x128xbf16, #tpu.memory_space<vmem>>, vector<1x144x128xbf16>
    %40 = vector.shape_cast %39 : vector<1x144x128xbf16> to vector<144x128xbf16>
    %cst_37 = arith.constant dense<0.000000e+00> : vector<16x128xf32>
    %41 = tpu.matmul %38, %40, %cst_37 {dimension_numbers = #tpu.dot_dimension_numbers<[1], [0], [0], [1], [0, 0, 1, 1], [], []>} : vector<16x144xbf16>, vector<144x128xbf16>, vector<16x128xf32> -> vector<16x128xf32>
    %42 = arith.addf %36, %41 : vector<16x128xf32>
    %c2_38 = arith.constant 2 : index
    %c0_39 = arith.constant 0 : index
    %43 = vector.load %arg7[%c2_38, %c0_39] : memref<18x144xf32, #tpu.memory_space<vmem>>, vector<16x144xf32>
    %44 = arith.truncf %43 : vector<16x144xf32> to vector<16x144xbf16>
    %c2_40 = arith.constant 2 : index
    %c0_41 = arith.constant 0 : index
    %c0_42 = arith.constant 0 : index
    %45 = vector.load %arg4[%c2_40, %c0_41, %c0_42] : memref<3x144x128xbf16, #tpu.memory_space<vmem>>, vector<1x144x128xbf16>
    %46 = vector.shape_cast %45 : vector<1x144x128xbf16> to vector<144x128xbf16>
    %cst_43 = arith.constant dense<0.000000e+00> : vector<16x128xf32>
    %47 = tpu.matmul %44, %46, %cst_43 {dimension_numbers = #tpu.dot_dimension_numbers<[1], [0], [0], [1], [0, 0, 1, 1], [], []>} : vector<16x144xbf16>, vector<144x128xbf16>, vector<16x128xf32> -> vector<16x128xf32>
    %48 = arith.addf %42, %47 : vector<16x128xf32>
    %c0_44 = arith.constant 0 : index
    %c1_45 = arith.constant 1 : index
    %c8_46 = arith.constant 8 : index
    %49 = vector.load %arg1[%c0_44, %c1_45, %c8_46] : memref<1x18x144xf32, #tpu.memory_space<vmem>>, vector<1x16x128xf32>
    %50 = vector.shape_cast %49 : vector<1x16x128xf32> to vector<16x128xf32>
    %c0_47 = arith.constant 0 : index
    %c0_48 = arith.constant 0 : index
    %51 = vector.load %arg5[%c0_47, %c0_48] : memref<1x128xf32, #tpu.memory_space<vmem>>, vector<1x128xf32>
    %52 = vector.broadcast %51 : vector<1x128xf32> to vector<16x128xf32>
    %53 = arith.addf %48, %52 : vector<16x128xf32>
    %54 = arith.addf %53, %50 : vector<16x128xf32>
    %cst_49 = arith.constant 0.000000e+00 : f32
    %55 = vector.broadcast %cst_49 : f32 to vector<16x128xf32>
    %56 = arith.maximumf %54, %55 : vector<16x128xf32>
    %c0_50 = arith.constant 0 : index
    %c0_51 = arith.constant 0 : index
    %c0_52 = arith.constant 0 : index
    %57 = vector.load %arg6[%c0_50, %c0_51, %c0_52] : memref<1x16x128xf32, #tpu.memory_space<vmem>>, vector<1x16x128xf32>
    %58 = vector.shape_cast %57 : vector<1x16x128xf32> to vector<16x128xf32>
    %59 = vector.shape_cast %56 : vector<16x128xf32> to vector<1x16x128xf32>
    tpu.vector_store %arg6[%c0_50, %c0_51, %c0_52], %59 {strides = array<i32>} : memref<1x16x128xf32, #tpu.memory_space<vmem>>, vector<1x16x128xf32>,
    return
  }
  func.func @transform_0(%arg0: i32) -> (i32, i32, i32) {
    %c0_i32 = arith.constant 0 : i32
    %c0_i32_0 = arith.constant 0 : i32
    %c0_i32_1 = arith.constant 0 : i32
    return %arg0, %c0_i32, %c0_i32_0 : i32, i32, i32
  }
  func.func @transform_1(%arg0: i32) -> (i32, i32, i32) {
    %c0_i32 = arith.constant 0 : i32
    %c0_i32_0 = arith.constant 0 : i32
    %c0_i32_1 = arith.constant 0 : i32
    %c0_i32_2 = arith.constant 0 : i32
    return %c0_i32, %c0_i32_0, %c0_i32_1 : i32, i32, i32
  }
  func.func @transform_2(%arg0: i32) -> (i32, i32) {
    %c0_i32 = arith.constant 0 : i32
    %c0_i32_0 = arith.constant 0 : i32
    %c0_i32_1 = arith.constant 0 : i32
    return %c0_i32, %c0_i32_0 : i32, i32
  }
  func.func @transform_3(%arg0: i32) -> (i32, i32, i32) {
    %c0_i32 = arith.constant 0 : i32
    %c0_i32_0 = arith.constant 0 : i32
    %c0_i32_1 = arith.constant 0 : i32
    %c0_i32_2 = arith.constant 0 : i32
    return %c0_i32, %c0_i32_0, %c0_i32_1 : i32, i32, i32
  }
  func.func @transform_4(%arg0: i32) -> (i32, i32) {
    %c0_i32 = arith.constant 0 : i32
    %c0_i32_0 = arith.constant 0 : i32
    %c0_i32_1 = arith.constant 0 : i32
    return %c0_i32, %c0_i32_0 : i32, i32
  }
  func.func @transform_5(%arg0: i32) -> (i32, i32, i32) {
    %c0_i32 = arith.constant 0 : i32
    %c0_i32_0 = arith.constant 0 : i32
    %c0_i32_1 = arith.constant 0 : i32
    return %arg0, %c0_i32, %c0_i32_0 : i32, i32, i32
  }
}

</mosaic_0001>

<bundles_post_ra>
// kernel: tpu_custom_call.1
= control target key start
LH: loop header
LB: loop body
LE: loop exit
PB: predicated region body
PF: predicated region fallthrough
CT: control target
= control target key end

     0   :  { %10 = vsyncpa [#allocation4], 0  ;;  %s1892_s0 = inlined_call_operand.vmem [shape: f32[2,18,144], index: 0, kind: input, shape index: {}]   ;;  %s1893_s1 = inlined_call_operand.hbm [shape: bf16[3,144,128], index: 1, kind: input, shape index: {}]   ;;  %s1894_s2 = inlined_call_operand.vmem [shape: f32[1,128], index: 2, kind: input, shape index: {}]   ;;  %s1895_s3 = inlined_call_operand.hbm [shape: bf16[3,144,128], index: 3, kind: input, shape index: {}]   ;;  %s1896_s4 = inlined_call_operand.vmem [shape: f32[1,128], index: 4, kind: input, shape index: {}]   ;;  %s1897_s5 = inlined_call_operand.hbm [shape: f32[2,16,128], index: 5, kind: output, shape index: {}]  }
   0x1   :  { %11 = vsyncpa [#allocation7], 0 }
   0x2   :  { %12 = vsyncpa [#allocation5], 0 }
   0x3   :  { %14 = vsyncpa [#allocation5 + $0x1], 0  ;;  %s1633_s18 = smov 0   ;;  %s1635_s19 = smov 0  }
   0x4   :  { %s1637_s20 = smov 0   ;;  %s1639_s21 = smov 0  }
   0x5 LB: > { %s1654_s22 = sadd.s32 4294967295, %s1591_s21   ;;  %s1271_s23 = sadd.s32 4294967294, %s1591_s21   ;;  %s1591_s21 = sphi %s1639_s21, %s1911_s21   ;;  %s1587_s20 = sphi %s1637_s20, %s1910_s20   ;;  %s1583_s19 = sphi %s1635_s19, %s1909_s19   ;;  %s1579_s18 = sphi %s1633_s18, %s1908_s18  }
   0x6   : > { %s1658_s24 = sadd.s32 1, %s1591_s21   ;;  %s137_s25 = sadd.s32 1, %s1587_s20 }
   0x7   : > { %s134_s26 = ssub.s32 %s1591_s21, %s1658_s24  ;;  %p147_p0 = scmp.ne.s32.totalorder %s1587_s20, %s1583_s19 }
   0x8   : > { %p135_p1 = scmp.eq.s32.totalorder %s134_s26, 0  ;;  %p148_p2 = scmp.eq.s32.totalorder %s1654_s22, 1 }
   0x9   : > { %p153_p3 = scmp.ne.s32.totalorder %s1583_s19, %s1579_s18  ;;  %p154_p4 = scmp.eq.s32.totalorder %s1271_s23, 1 }
   0xa   : > { %s1669_s27 = scalar_select %p135_p1, %s1587_s20, %s137_s25  }
   0xb   : > { %p1671_p5 = por %p148_p2, %p147_p0  ;;  %p1675_p6 = por %p154_p4, %p153_p3 }
   0xc   : > { %p1272_p7 = scmp.ge.s32.totalorder %s1591_s21, 1  ;;  %p161_p8 = scmp.lt.s32.totalorder %s1591_s21, 3 }
   0xd   : > { %s1900_s29 = scalar_select %p1675_p6, 1, 0 }
   0xe   : > { %p1898_p9 = scmp.eq.s32.totalorder %s1654_s22, 0  ;;  %p1682_p10 = pnand %p1272_p7, %p161_p8 }
   0xf   : > { %s1593_s6 = smov [#allocation3]   ;;  %s1594_s9 = smov [#allocation6]  }
  0x10   : > { %s173_s7 = sshll.u32 %s1593_s6, 4  ;;  %p1360_p11 = pneg %p1682_p10  ;;  %s174_s7 = int_to_ptr.vmem [resolvable:$true] %s173_s7 }
  0x11   : > { %s189_s10 = sshll.u32 %s1594_s9, 4  ;;  %s1482_s11 = scalar_lea.vmem %s174_s7, 3456  ;;  %s190_s10 = int_to_ptr.vmem [resolvable:$true] %s189_s10 }
  0x12   : > { %p1690_p12 = pnand %p1898_p9, %p1360_p11  ;;  %p1483_p0 = scmp.ne.s32.totalorder %s174_s7, %s1482_s11 }
  0x13   : > { %p1490_p3 = scmp.lt.s32.totalorder %s174_s7, %s174_s7  ;;  %p1491_p4 = scmp.lt.s32.totalorder %s1482_s11, %s1482_s11 }
  0x14   : > { %p1473_p13 = pneg %p1690_p12 }
  0x15   : > { %p1492_p7 = por %p1491_p4, %p1490_p3 }
  0x16   : > { %p1485_p1 = pnand %p1483_p0, %p1473_p13 }
  0x18   : > { %p1486_p2 = pneg %p1485_p1 }
  0x1a   : > { %p1493_p8 = pnand %p1492_p7, %p1486_p2 }
  0x1c   : > { %1496 = shalt.err (!%p1493_p8)
}
  0x1d   : > { %s1595_s12 = smov 64   ;;  %s1596_s13 = smov 4  }
  0x1e   : > { %1363 = dma.hbm_to_vmem [thread:$0]  (!%p1690_p12), %s1893_s1, 3456, %s174_s7, [#allocation4], %s1595_s12, %s1595_s12, %s1596_s13  }
  0x1f   : > { %s1508_s16 = scalar_lea.vmem %s190_s10, 3456  ;;  %p1516_p9 = scmp.lt.s32.totalorder %s190_s10, %s190_s10 }
  0x20   : > { %p1509_p11 = scmp.ne.s32.totalorder %s190_s10, %s1508_s16  ;;  %p1517_p6 = scmp.lt.s32.totalorder %s1508_s16, %s1508_s16 }
  0x22   : > { %p1511_p0 = pnand %p1509_p11, %p1473_p13  ;;  %p1518_p3 = por %p1517_p6, %p1516_p9 }
  0x24   : > { %p1512_p1 = pneg %p1511_p0 }
  0x26   : > { %p1519_p2 = pnand %p1518_p3, %p1512_p1 }
  0x28   : > { %1522 = shalt.err (!%p1519_p2)
}
  0x29   : > { %1366 = dma.hbm_to_vmem [thread:$0]  (!%p1690_p12), %s1895_s3, 3456, %s190_s10, [#allocation7], %s1595_s12, %s1595_s12, %s1596_s13  }
  0x2a   : > { %216 = sbr.rel (%p1682_p10) target bundleno = 720 (0x2d0), region = 40  ;;  %p1903_p4 = scmp.eq.s32.totalorder (!%p1682_p10), %s1654_s22, 0 }
  0x2f   : > { %1566 = dma.done.wait (%p1903_p4), [#allocation4], 3456   ;;  %p1904_p13 = pmov %p1903_p4 }
  0x30   : > { %p1905_p7 = pmov %p1903_p4 }
  0x31   : > { %1568 = vsyncadd (%p1904_p13), [#allocation4], 4294963840 }
  0x32   : > { %1570 = dma.done.wait (%p1905_p7), [#allocation7], 3456   ;;  %p1906_p6 = pmov %p1903_p4 }
  0x33   : > { %v1597_v0 = vmov 0   ;;  %v1417_v1 = vld [vmem:[#allocation3 + $0x80] sm:$0xff]   ;;  %v1418_v2 = vld [vmem:[#allocation3 + $0x38] sm:$0xff]   ;;  %v1420_v4 = vld [vmem:[#allocation3 + $0x30] sm:$0xff]   ;;  %p248_p9 = scmp.lt.s32.totalorder %s1654_s22, 1  ;;  %vm385_vm0 = vcmask 130048  }
  0x34   : > { %1572 = vsyncadd (%p1906_p6), [#allocation7], 4294963840  ;;  %389 = vmatprep.subr.bf16.mxu0 %v1597_v0  ;;  %487 = vmatprep.subr.bf16.mxu1 %v1597_v0  ;;  %v1419_v3 = vld [vmem:[#allocation3 + $0x78] sm:$0xff]   ;;  %v1421_v5 = vld [vmem:[#allocation3 + $0x70] sm:$0xff]   ;;  %vm305_vm1 = vsmask.f32 7424 }
  0x35   : > { %390 = vmatpush1.bf16.msra.mxu0 %v1417_v1  ;;  %488 = vmatpush1.bf16.msra.mxu1 %v1418_v2  ;;  %v1422_v6 = vld [vmem:[#allocation3 + $0x28] sm:$0xff]   ;;  %s249_s25 = scalar_select %p248_p9, %s1654_s22, 1  ;;  %v1424_v8 = vld [vmem:[#allocation3 + $0x20] sm:$0xff]   ;;  %v1426_v10 = vld [vmem:[#allocation3 + $0x18] sm:$0xff]   ;;  %vm559_vm2 = vcmask 1046528   ;;  %vm683_vm3 = vcmask 123904  }
  0x36   : > { %391 = vmatprep.subr.bf16.mxu0 %v1597_v0  ;;  %489 = vmatprep.subr.bf16.mxu1 %v1597_v0  ;;  %v1423_v7 = vld [vmem:[#allocation3 + $0x68] sm:$0xff]   ;;  %v1425_v9 = vld [vmem:[#allocation3 + $0x60] sm:$0xff]   ;;  %v1427_v11 = vld [vmem:[#allocation3 + $0x58] sm:$0xff]   ;;  %s1599_s10 = smov 8   ;;  %vm687_vm4 = vcmask 1040384   ;;  %s1600_s11 = smov 120  }
  0x37   : > { %s1349_s26 = smul.u32 48, %s249_s25  ;;  %v1428_v12 = vld [vmem:[#allocation3 + $0x10] sm:$0xff]   ;;  %v1430_v30 = vld [vmem:[#allocation3 + $0x8] sm:$0xff]   ;;  %v1432_v38 = vld [vmem:[#allocation3] sm:$0xff]   ;;  %vm700_vm5 = vcmask 1047617   ;;  %vm702_vm6 = vcmask 64513  }
  0x38   : > { %v1429_v27 = vld [vmem:[#allocation3 + $0x50] sm:$0xff]   ;;  %v1431_v33 = vld [vmem:[#allocation3 + $0x48] sm:$0xff]   ;;  %v1434_v44 = vld [vmem:[#allocation3 + $0x40] sm:$0xff]   ;;  %vm708_vm7 = vcmask 1040448   ;;  %vm710_vm8 = vcmask 57344   ;;  %vm704_vm9 = vcmask 1047616  }
  0x39   : > { %392 = vmatpush1.bf16.msra.mxu0 %v1419_v3  ;;  %490 = vmatpush1.bf16.msra.mxu1 %v1420_v4  ;;  %s1736_s7 = scalar_lea.vmem %s1892_s0, %s1349_s26  ;;  %v1433_v40 = vld [vmem:[#allocation3 + $0x88] sm:$0xff]   ;;  %v1436_v54 = vld [vmem:[#allocation3 + $0xc0] sm:$0xff]   ;;  %v1437_v56 = vld [vmem:[#allocation3 + $0xb8] sm:$0xff]   ;;  %vm706_vm10 = vcmask 64512   ;;  %vm1162_vm11 = vcmask 982016   ;;  %s245_s14 = sand.u32 1, %s1583_s19  }
  0x3a   : > { %393 = vmatprep.subr.bf16.mxu0 %v1597_v0  ;;  %491 = vmatprep.subr.bf16.mxu1 %v1597_v0  ;;  %v1740_v13 = vld [vmem:[%s1736_s7 + $0x18] sm:$0xff]  ;;  %v279_v14 = vld [vmem:[%s1736_s7 + $0x8] sm:$0xfe]  ;;  %v281_v15 = vld [vmem:[%s1736_s7 + $0x28] sm:$0x1]  ;;  %s1279_s15 = sshll.u32 %s245_s14, 4 }
  0x3b   : > { %v283_v16 = vpack.c.bf16 %v1740_v13, %v279_v14  ;;  %v285_v17 = vpack.c.bf16 %v281_v15, %v281_v15  ;;  %v255_v18 = vld [vmem:[%s1736_s7 + $0x8] sm:$0xff]  ;;  %v1748_v19 = vld [vmem:[%s1736_s7 + $0x10] sm:$0xff]  ;;  %v278_v20 = vld [vmem:[%s1736_s7] sm:$0xfe]  ;;  %s247_s16 = scalar_lea.vmem [#allocation8], %s1279_s15  ;;  %s1348_s23 = sshll.u32 %s1654_s22, 8 }
  0x3c   : > { %v259_v21 = vpack.c.bf16 %v1740_v13, %v255_v18  ;;  %v280_v22 = vld [vmem:[%s1736_s7 + $0x20] sm:$0x1]  ;;  %v282_v23 = vpack.c.bf16 %v1748_v19, %v278_v20  ;;  %v529_v43 = vld [vmem:[%s1736_s7 + $0x8] sm:$0xfc]  ;;  %v531_v46 = vld [vmem:[%s1736_s7 + $0x28] sm:$0x3]  ;;  %s1849_s30 = scalar_lea.hbm %s1897_s5, %s1348_s23 }
  0x3d   : > { %394 = vmatpush1.bf16.msra.mxu0 %v1421_v5  ;;  %492 = vmatpush1.bf16.msra.mxu1 %v1422_v6  ;;  %v319_v24 = vshrl.u32 %v283_v16, 16  ;;  %v321_v25 = vshll.u32 %v283_v16, 16  ;;  %v326_v26 = vshll.u32 %v285_v17, 16  ;;  %v284_v28 = vpack.c.bf16 %v280_v22, %v280_v22  ;;  %v254_v45 = vld [vmem:[%s1736_s7] sm:$0xff]  ;;  %v1435_v52 = vld [vmem:[#allocation3 + $0xc8] sm:$0xff]   ;;  %v1440_v59 = vld [vmem:[#allocation3 + $0xa0] sm:$0xff]  }
  0x3e   : > { %395 = vmatprep.subr.bf16.mxu0 %v1597_v0  ;;  %493 = vmatprep.subr.bf16.mxu1 %v1597_v0  ;;  %v309_v29 = vshll.u32 %v282_v23, 16  ;;  %v307_v35 = vshrl.u32 %v282_v23, 16  ;;  %v533_v47 = vpack.c.bf16 %v1740_v13, %v529_v43  ;;  %v535_v48 = vpack.c.bf16 %v531_v46, %v531_v46  ;;  %v1438_v57 = vld [vmem:[#allocation3 + $0xb0] sm:$0xff]   ;;  %v1439_v58 = vld [vmem:[#allocation3 + $0xa8] sm:$0xff]   ;;  %v1441_v60 = vld [vmem:[#allocation3 + $0x98] sm:$0xff]   ;;  %s1187_s17 = sshll.u32 %s247_s16, 4  ;;  %s1844_s17 = int_to_ptr.vmem [resolvable:$true] %s1187_s17 }
  0x3f   : > { %1300 = vmatprep.mubr.msk.bf16.mxu1 %vm385_vm0, %v259_v21  ;;  %v323_v31 = vrot.slane %v321_v25, 1  ;;  %v328_v32 = vrot.slane %v326_v26, 1  ;;  %v314_v37 = vshll.u32 %v284_v28, 16  ;;  %v258_v51 = vpack.c.bf16 %v1748_v19, %v254_v45  ;;  %v528_v61 = vld [vmem:[%s1736_s7] sm:$0xfc]  ;;  %v1450_v14 = vld [vmem:[#allocation6 + $0x70] sm:$0xff]  }
  0x40   : > { %v311_v36 = vrot.slane %v309_v29, 1  ;;  %v563_v49 = vrot.slane %v533_v47, 1  ;;  %v564_v53 = vrot.slane %v535_v48, 1  ;;  %v530_v62 = vld [vmem:[%s1736_s7 + $0x20] sm:$0x3]  ;;  %v532_v1 = vpack.c.bf16 %v1748_v19, %v528_v61  ;;  %v1449_v15 = vld [vmem:[#allocation6 + $0x20] sm:$0xff]  }
  0x41   : > { %396 = vmatpush1.bf16.msra.mxu0 %v1423_v7  ;;  %494 = vmatpush1.bf16.msra.mxu1 %v1424_v8  ;;  %v324_v34 = vor.u32 %v323_v31, %v319_v24  ;;  %v316_v42 = vrot.slane %v314_v37, 1  ;;  %v1442_v63 = vld [vmem:[#allocation3 + $0x90] sm:$0xff]   ;;  %v534_v2 = vpack.c.bf16 %v530_v62, %v530_v62  ;;  %v1446_v8 = vld [vmem:[#allocation6 + $0x80] sm:$0xff]   ;;  %v1452_v16 = vld [vmem:[#allocation6 + $0x68] sm:$0xff]   ;;  %s1851_s6 = scalar_lea.sflag [#allocation5], %s245_s14  ;;  %s1601_s22 = smov [#allocation8]  }
  0x42   : > { %397 = vmatprep.subr.bf16.mxu0 %v1597_v0  ;;  %495 = vmatprep.subr.bf16.mxu1 %v1597_v0  ;;  %v312_v41 = vor.u32 %v311_v36, %v307_v35  ;;  %v565_v55 = vsel %vm559_vm2, %v563_v49, %v564_v53  ;;  %v1443_v3 = vld [vmem:[#allocation3 + $0xd0] sm:$0xff]   ;;  %v560_v4 = vrot.slane %v532_v1, 1  ;;  %v1454_v28 = vld [vmem:[#allocation6 + $0x60] sm:$0xff]   ;;  %v1460_v47 = vld [vmem:[#allocation6 + $0x48] sm:$0xff]   ;;  %v1145_v53 = vrot.slane %v1748_v19, 1  ;;  %s1527_s8 = sshll.u32 %s1601_s22, 4  ;;  %s1528_s8 = int_to_ptr.vmem [resolvable:$false] %s1527_s8 }
  0x43   : > { %v329_v39 = vsel %vm305_vm1, %v324_v34, %v328_v32  ;;  %v561_v5 = vrot.slane %v534_v2, 1  ;;  %v1444_v7 = vld [vmem:[#allocation6 + $0x38] sm:$0xff]   ;;  %v1455_v32 = vld [vmem:[#allocation6 + $0x8] sm:$0xff]   ;;  %v1457_v36 = vld [vmem:[#allocation6] sm:$0xff]   ;;  %s1529_s9 = scalar_lea.vmem %s1528_s8, 512  ;;  %p1530_p11 = scmp.lt.s32.totalorder %s1844_s17, %s1528_s8 }
  0x44   : > { %1290 = vmatprep.mubr.msk.bf16.mxu0 %vm385_vm0, %v329_v39  ;;  %v317_v50 = vsel %vm305_vm1, %v312_v41, %v316_v42  ;;  %v1451_v17 = vld [vmem:[#allocation6 + $0x18] sm:$0xff]   ;;  %v1458_v39 = vld [vmem:[#allocation6 + $0x50] sm:$0xff]  }
  0x45   : > { %398 = vmatpush1.bf16.msra.mxu0 %v1425_v9  ;;  %496 = vmatpush1.bf16.msra.mxu1 %v1426_v10  ;;  %v562_v6 = vsel %vm559_vm2, %v560_v4, %v561_v5  ;;  %v1598_v9 = vmov 0.0   ;;  %v1445_v10 = vld [vmem:[#allocation6 + $0x30] sm:$0xff]   ;;  %v1311_v31 = vld [vmem:[%s1894_s2] ss:$0 sm:$0xff] }
  0x46   : > { %399 = vmatprep.subr.bf16.mxu0 %v1597_v0  ;;  %497 = vmatprep.subr.bf16.mxu1 %v1597_v0  ;;  %678 = vst [vmem:[#allocation2] sm:$0xff] %v1598_v9  ;;  %679 = vst.msk [vmem:[#allocation2 + $0x8] sm:$0xff] %vm385_vm0, %v1598_v9  ;;  %v1456_v34 = vld [vmem:[#allocation6 + $0x58] sm:$0xff]  }
  0x47   : > { %680 = vst [vmem:[#allocation2 + $0x10] sm:$0xff] %v1598_v9  ;;  %681 = vst.msk [vmem:[#allocation2 + $0x18] sm:$0xff] %vm385_vm0, %v1598_v9 }
  0x48   : > { %682 = vst [vmem:[#allocation2 + $0x20] sm:$0x3] %v1598_v9  ;;  %684 = vst.msk [vmem:[#allocation2 + $0x28] sm:$0x3] %vm683_vm3, %v1598_v9 }
  0x49   : > { %400 = vmatpush1.bf16.msra.mxu0 %v1427_v11  ;;  %498 = vmatpush1.bf16.msra.mxu1 %v1428_v12  ;;  %v1448_v11 = vld [vmem:[#allocation6 + $0x78] sm:$0xff]   ;;  %v1447_v12 = vld [vmem:[#allocation6 + $0x28] sm:$0xff]  }
  0x4a   : > { %401 = vmatprep.subr.bf16.mxu0 %v1597_v0  ;;  %499 = vmatprep.subr.bf16.mxu1 %v1597_v0 }
  0x4d   : > { %402 = vmatpush1.bf16.msra.mxu0 %v1429_v27  ;;  %500 = vmatpush1.bf16.msra.mxu1 %v1430_v30  ;;  %v1453_v27 = vld [vmem:[#allocation6 + $0x10] sm:$0xff]  }
  0x4e   : > { %403 = vmatprep.subr.bf16.mxu0 %v1597_v0  ;;  %501 = vmatprep.subr.bf16.mxu1 %v1597_v0 }
  0x51   : > { %404 = vmatpush1.bf16.msra.mxu0 %v1431_v33  ;;  %502 = vmatpush1.bf16.msra.mxu1 %v1432_v38 }
  0x52   : > { %419 = vmatprep.subr.bf16.mxu0 %v1597_v0  ;;  %517 = vmatprep.subr.bf16.mxu1 %v1597_v0 }
  0x55   : > { %420 = vmatpush2.bf16.msra.mxu0 %v1433_v40  ;;  %518 = vmatpush2.bf16.msra.mxu1 %v1434_v44  ;;  %v1459_v44 = vld [vmem:[#allocation6 + $0x40] sm:$0xff]  }
  0x56   : > { %624 = vmatprep.subr.bf16.mxu0 %v1597_v0  ;;  %845 = vmatprep.subr.bf16.mxu1 %v1597_v0 }
  0x58   : > { %422 = vmatmul.mubr.bf16.vlgmr.msra.gmra.mxu0 %v317_v50  ;;  %520 = vmatmul.mubr.bf16.vlgmr.msra.gmra.mxu1 %v258_v51  ;;  %v1461_v50 = vld [vmem:[#allocation6 + $0x88] sm:$0xff]  }
  0x59   : > { %625 = vmatpush1.bf16.msra.mxu0 %v1435_v52  ;;  %1310 = vmatprep.mubr.msk.bf16.mxu0 %vm385_vm0, %v565_v55  ;;  %v1122_v52 = vld [vmem:[%s1736_s7] sm:$0xfe] }
  0x5a   : > { %626 = vmatprep.subr.bf16.mxu0 %v1597_v0  ;;  %846 = vmatpush1.bf16.msra.mxu1 %v1446_v8  ;;  %v1144_v55 = vrot.slane %v1122_v52, 1 }
  0x5b   : > { %847 = vmatprep.subr.bf16.mxu1 %v1597_v0 }
  0x5c   : > { %v1146_v61 = vsel %vm559_vm2, %v1144_v55, %v1145_v53 }
  0x5d   : > { %627 = vmatpush1.bf16.msra.mxu0 %v1436_v54  ;;  %v1123_v54 = vld [vmem:[%s1736_s7 + $0x8] sm:$0xfe] }
  0x5e   : > { %628 = vmatprep.subr.bf16.mxu0 %v1597_v0  ;;  %848 = vmatpush1.bf16.msra.mxu1 %v1448_v11 }
  0x5f   : > { %849 = vmatprep.subr.bf16.mxu1 %v1597_v0 }
  0x61   : > { %629 = vmatpush1.bf16.msra.mxu0 %v1437_v56  ;;  %v1147_v56 = vrot.slane %v1123_v54, 1 }
  0x62   : > { %630 = vmatprep.subr.bf16.mxu0 %v1597_v0  ;;  %850 = vmatpush1.bf16.msra.mxu1 %v1450_v14 }
  0x63   : > { %851 = vmatprep.subr.bf16.mxu1 %v1597_v0 }
  0x65   : > { %631 = vmatpush1.bf16.msra.mxu0 %v1438_v57  ;;  %v1148_v57 = vrot.slane %v1740_v13, 1 }
  0x66   : > { %632 = vmatprep.subr.bf16.mxu0 %v1597_v0  ;;  %852 = vmatpush1.bf16.msra.mxu1 %v1452_v16 }
  0x67   : > { %853 = vmatprep.subr.bf16.mxu1 %v1597_v0  ;;  %v1149_v62 = vsel %vm559_vm2, %v1147_v56, %v1148_v57 }
  0x69   : > { %633 = vmatpush1.bf16.msra.mxu0 %v1439_v58  ;;  %v1126_v58 = vld [vmem:[%s1736_s7 + $0x20] sm:$0x1] }
  0x6a   : > { %634 = vmatprep.subr.bf16.mxu0 %v1597_v0  ;;  %854 = vmatpush1.bf16.msra.mxu1 %v1454_v28 }
  0x6b   : > { %855 = vmatprep.subr.bf16.mxu1 %v1597_v0 }
  0x6d   : > { %635 = vmatpush1.bf16.msra.mxu0 %v1440_v59  ;;  %v1150_v59 = vrot.slane %v1126_v58, 1 }
  0x6e   : > { %636 = vmatprep.subr.bf16.mxu0 %v1597_v0  ;;  %856 = vmatpush1.bf16.msra.mxu1 %v1456_v34 }
  0x6f   : > { %857 = vmatprep.subr.bf16.mxu1 %v1597_v0  ;;  %v1151_v1 = vsel %vm559_vm2, %v1145_v53, %v1150_v59  ;;  %v1470_v53 = vld [vmem:[#allocation6 + $0xd0] sm:$0xff]  }
  0x71   : > { %637 = vmatpush1.bf16.msra.mxu0 %v1441_v60  ;;  %v1127_v60 = vld [vmem:[%s1736_s7 + $0x28] sm:$0x1]  ;;  %s1523_s7 = scalar_lea.vmem %s1844_s17, 256 }
  0x72   : > { %638 = vmatprep.subr.bf16.mxu0 %v1597_v0  ;;  %858 = vmatpush1.bf16.msra.mxu1 %v1458_v39  ;;  %p1524_p10 = scmp.ne.s32.totalorder %s1844_s17, %s1523_s7  ;;  %p1531_p0 = scmp.lt.s32.totalorder %s1529_s9, %s1523_s7 }
  0x73   : > { %859 = vmatprep.subr.bf16.mxu1 %v1597_v0 }
  0x74   : > { %p1525_p12 = pnand %p1524_p10, %p1671_p5  ;;  %p1532_p1 = por %p1531_p0, %p1530_p11 }
  0x75   : > { %639 = vmatpush1.bf16.msra.mxu0 %v1442_v63  ;;  %v1152_v63 = vrot.slane %v1127_v60, 1 }
  0x76   : > { %654 = vmatprep.subr.bf16.mxu0 %v1597_v0  ;;  %860 = vmatpush1.bf16.msra.mxu1 %v1460_v47  ;;  %v1468_v47 = vld [vmem:[#allocation6 + $0x98] sm:$0xff]   ;;  %p1526_p8 = pneg %p1525_p12 }
  0x77   : > { %875 = vmatprep.subr.bf16.mxu1 %v1597_v0  ;;  %v1153_v19 = vsel %vm559_vm2, %v1148_v57, %v1152_v63 }
  0x78   : > { %p1533_p3 = pnand %p1532_p1, %p1526_p8 }
  0x79   : > { %655 = vmatpush2.bf16.msra.mxu0 %v1443_v3 }
  0x7a   : > { %943 = vmatprep.subr.bf16.mxu0 %v1597_v0  ;;  %876 = vmatpush2.bf16.msra.mxu1 %v1461_v50 }
  0x7b   : > { %1079 = vmatprep.subr.bf16.mxu1 %v1597_v0 }
  0x7c   : > { %657 = vmatmul.mubr.bf16.vlgmr.msra.gmra.mxu0 %v562_v6 }
  0x7d   : > { %944 = vmatpush1.bf16.msra.mxu0 %v1444_v7 }
  0x7e   : > { %945 = vmatprep.subr.bf16.mxu0 %v1597_v0 }
  0x81   : > { %946 = vmatpush1.bf16.msra.mxu0 %v1445_v10 }
  0x82   : > { %947 = vmatprep.subr.bf16.mxu0 %v1597_v0 }
  0x85   : > { %948 = vmatpush1.bf16.msra.mxu0 %v1447_v12 }
  0x86   : > { %949 = vmatprep.subr.bf16.mxu0 %v1597_v0 }
  0x89   : > { %950 = vmatpush1.bf16.msra.mxu0 %v1449_v15 }
  0x8a   : > { %951 = vmatprep.subr.bf16.mxu0 %v1597_v0 }
  0x8d   : > { %952 = vmatpush1.bf16.msra.mxu0 %v1451_v17 }
  0x8e   : > { %953 = vmatprep.subr.bf16.mxu0 %v1597_v0 }
  0x91   : > { %954 = vmatpush1.bf16.msra.mxu0 %v1453_v27 }
  0x92   : > { %955 = vmatprep.subr.bf16.mxu0 %v1597_v0 }
  0x95   : > { %956 = vmatpush1.bf16.msra.mxu0 %v1455_v32 }
  0x96   : > { %957 = vmatprep.subr.bf16.mxu0 %v1597_v0 }
  0x99   : > { %958 = vmatpush1.bf16.msra.mxu0 %v1457_v36 }
  0x9a   : > { %973 = vmatprep.subr.bf16.mxu0 %v1597_v0 }
  0x9d   : > { %974 = vmatpush2.bf16.msra.mxu0 %v1459_v44  ;;  %v1465_v44 = vld [vmem:[#allocation6 + $0xb0] sm:$0xff]  }
 0x118   : > { %v423_v18 = vpop.f32.mrf.mxu0  ;;  %v521_v20 = vpop.f32.mrf.mxu1 }
 0x119   : > { %v522_v29 = vadd.f32 %v521_v20, %v423_v18 }
 0x11a   : > { %v425_v21 = vpop.f32.mrf.mxu0  ;;  %v523_v22 = vpop.f32.mrf.mxu1 }
 0x11c   : > { %v426_v23 = vpop.f32.mrf.mxu0  ;;  %v524_v24 = vpop.f32.mrf.mxu1 }
 0x11d   : > { %v525_v37 = vadd.f32 %v524_v24, %v426_v23 }
 0x11e   : > { %v428_v25 = vpop.f32.mrf.mxu0  ;;  %v526_v26 = vpop.f32.mrf.mxu1 }
 0x13c   : > { %v658_v30 = vpop.f32.mrf.mxu0 }
 0x13d   : > { %v665_v33 = vadd.f32 %v658_v30, %v522_v29 }
 0x13e   : > { %v660_v35 = vpop.f32.mrf.mxu0 }
 0x13f   : > { %v674_v38 = vadd.f32 %v1311_v31, %v665_v33 }
 0x140   : > { %v661_v40 = vpop.f32.mrf.mxu0 }
 0x141   : > { %v666_v41 = vadd.f32 %v661_v40, %v525_v37  ;;  %v676_v42 = vmax.f32 %v674_v38, 0.0  ;;  %v1462_v38 = vld [vmem:[#allocation6 + $0xc8] sm:$0xff]  }
 0x142   : > { %v663_v43 = vpop.f32.mrf.mxu0 }
 0x143   : > { %v688_v45 = vrot.slane %v676_v42, 7  ;;  %v675_v46 = vadd.f32 %v1311_v31, %v666_v41  ;;  %v1463_v42 = vld [vmem:[#allocation6 + $0xc0] sm:$0xff]   ;;  %v1464_v43 = vld [vmem:[#allocation6 + $0xb8] sm:$0xff]  }
 0x145   : > { %691 = vrot.lane.b32.xlu0 %v688_v45, %s1599_s10  ;;  %v677_v48 = vmax.f32 %v675_v46, 0.0  ;;  %v1467_v46 = vld [vmem:[#allocation6 + $0xa0] sm:$0xff]  }
 0x147   : > { %v689_v49 = vrot.slane %v677_v48, 7 }
 0x149   : > { %695 = vrot.lane.b32.xlu1 %v689_v49, %s1599_s10  ;;  %v690_v51 = vsel %vm687_vm4, %v688_v45, %v689_v49  ;;  %v1466_v45 = vld [vmem:[#allocation6 + $0xa8] sm:$0xff]   ;;  %v1469_v49 = vld [vmem:[#allocation6 + $0x90] sm:$0xff]  }
 0x14a   : > { %693 = vrot.lane.b32.xlu0 %v690_v51, %s1599_s10 }
 0x14d   : > { %1154 = vrot.lane.b32.xlu1 %v1146_v61, %s1600_s11 }
 0x14e   : > { %1156 = vrot.lane.b32.xlu0 %v1149_v62, %s1600_s11 }
 0x151   : > { %1158 = vrot.lane.b32.xlu1 %v1151_v1, %s1600_s11 }
 0x152   : > { %1160 = vrot.lane.b32.xlu0 %v1153_v19, %s1600_s11 }
 0x1b7   : > { %v692_v13 = vpop.permute.xlu0 %691 }
 0x1b8   : > { %701 = vst.msk [vmem:[#allocation2] sm:$0xfe] %vm700_vm5, %v692_v13 }
 0x1b9   : > { %703 = vst.msk [vmem:[#allocation2 + $0x8] sm:$0xfe] %vm702_vm6, %v692_v13 }
 0x1bb   : > { %v696_v2 = vpop.permute.xlu1 %695 }
 0x1bc   : > { %709 = vst.msk [vmem:[#allocation2 + $0x20] sm:$0x1] %vm708_vm7, %v696_v2  ;;  %v694_v3 = vpop.permute.xlu0 %693 }
 0x1bd   : > { %711 = vst.msk [vmem:[#allocation2 + $0x28] sm:$0x1] %vm710_vm8, %v696_v2 }
 0x1be   : > { %705 = vst.msk [vmem:[#allocation2 + $0x10] sm:$0xff] %vm704_vm9, %v694_v3 }
 0x1bf   : > { %707 = vst.msk [vmem:[#allocation2 + $0x18] sm:$0xff] %vm706_vm10, %v694_v3  ;;  %v712_v5 = vld [vmem:[#allocation2] sm:$0xff]  ;;  %v1155_v19 = vpop.permute.xlu1 %1154 }
 0x1c0   : > { %v713_v4 = vld [vmem:[#allocation2 + $0x8] sm:$0xff]  ;;  %v736_v14 = vld [vmem:[#allocation2] sm:$0xfe]  ;;  %v1157_v13 = vpop.permute.xlu0 %1156  ;;  %v1342_v3 = vld [vmem:[%s1896_s4] ss:$0 sm:$0xff] }
 0x1c1   : > { %v737_v6 = vld [vmem:[#allocation2 + $0x8] sm:$0xfe]  ;;  %v984_v50 = vld [vmem:[#allocation2] sm:$0xfc] }
 0x1c2   : > { %v985_v22 = vld [vmem:[#allocation2 + $0x8] sm:$0xfc] }
 0x1c3   : > { %v738_v8 = vld [vmem:[#allocation2 + $0x20] sm:$0x1] }
 0x1c4   : > { %v739_v7 = vld [vmem:[#allocation2 + $0x28] sm:$0x1]  ;;  %v742_v15 = vpack.c.bf16 %v738_v8, %v738_v8  ;;  %v986_v48 = vld [vmem:[#allocation2 + $0x20] sm:$0x3] }
 0x1c5   : > { %v987_v9 = vld [vmem:[#allocation2 + $0x28] sm:$0x3]  ;;  %v714_v11 = vld [vmem:[#allocation2 + $0x10] sm:$0xff]  ;;  %v743_v12 = vpack.c.bf16 %v739_v7, %v739_v7  ;;  %v990_v52 = vpack.c.bf16 %v986_v48, %v986_v48 }
 0x1c6   : > { %v715_v10 = vld [vmem:[#allocation2 + $0x18] sm:$0xff]  ;;  %v716_v17 = vpack.c.bf16 %v714_v11, %v712_v5  ;;  %v740_v20 = vpack.c.bf16 %v714_v11, %v736_v14  ;;  %v991_v23 = vpack.c.bf16 %v987_v9, %v987_v9  ;;  %v771_v26 = vshll.u32 %v742_v15, 16  ;;  %v1159_v9 = vpop.permute.xlu1 %1158 }
 0x1c7   : > { %v717_v16 = vpack.c.bf16 %v715_v10, %v713_v4  ;;  %v741_v18 = vpack.c.bf16 %v715_v10, %v737_v6  ;;  %v783_v21 = vshll.u32 %v743_v12, 16  ;;  %v989_v27 = vpack.c.bf16 %v715_v10, %v985_v22  ;;  %v1161_v10 = vpop.permute.xlu0 %1160 }
 0x1c8   : > { %v766_v25 = vshll.u32 %v740_v20, 16  ;;  %v764_v30 = vshrl.u32 %v740_v20, 16  ;;  %v1019_v33 = vrot.slane %v991_v23, 1  ;;  %v773_v36 = vrot.slane %v771_v26, 1 }
 0x1c9   : > { %1331 = vmatprep.mubr.msk.bf16.mxu0 %vm385_vm0, %v717_v16  ;;  %v778_v24 = vshll.u32 %v741_v18, 16  ;;  %v776_v28 = vshrl.u32 %v741_v18, 16  ;;  %v785_v32 = vrot.slane %v783_v21, 1  ;;  %v1018_v37 = vrot.slane %v989_v27, 1 }
 0x1ca   : > { %976 = vmatmul.mubr.bf16.vlgmr.msra.gmra.mxu0 %v716_v17  ;;  %v768_v31 = vrot.slane %v766_v25, 1  ;;  %v988_v51 = vpack.c.bf16 %v714_v11, %v984_v50  ;;  %v1016_v55 = vrot.slane %v990_v52, 1  ;;  %v1163_v6 = vsel %vm1162_vm11, %v1155_v19, %v1157_v13 }
 0x1cb   : > { %v780_v29 = vrot.slane %v778_v24, 1  ;;  %v1020_v41 = vsel %vm559_vm2, %v1018_v37, %v1019_v33  ;;  %v1164_v16 = vsel %vm1162_vm11, %v1159_v9, %v1161_v10 }
 0x1cc   : > { %v769_v35 = vor.u32 %v768_v31, %v764_v30  ;;  %v1015_v54 = vrot.slane %v988_v51, 1 }
 0x1cd   : > { %v781_v34 = vor.u32 %v780_v29, %v776_v28 }
 0x1ce   : > { %v774_v40 = vsel %vm305_vm1, %v769_v35, %v773_v36  ;;  %v1017_v56 = vsel %vm559_vm2, %v1015_v54, %v1016_v55 }
 0x1cf   : > { %v786_v39 = vsel %vm305_vm1, %v781_v34, %v785_v32 }
 0x1d0   : > { %1321 = vmatprep.mubr.msk.bf16.mxu1 %vm385_vm0, %v786_v39 }
 0x1d1   : > { %878 = vmatmul.mubr.bf16.vlgmr.msra.gmra.mxu1 %v774_v40 }
 0x1d2   : > { %1080 = vmatpush1.bf16.msra.mxu1 %v1462_v38  ;;  %1341 = vmatprep.mubr.msk.bf16.mxu1 %vm385_vm0, %v1020_v41 }
 0x1d3   : > { %1081 = vmatprep.subr.bf16.mxu1 %v1597_v0 }
 0x1d6   : > { %1082 = vmatpush1.bf16.msra.mxu1 %v1463_v42 }
 0x1d7   : > { %1083 = vmatprep.subr.bf16.mxu1 %v1597_v0 }
 0x1da   : > { %1084 = vmatpush1.bf16.msra.mxu1 %v1464_v43 }
 0x1db   : > { %1085 = vmatprep.subr.bf16.mxu1 %v1597_v0 }
 0x1de   : > { %1086 = vmatpush1.bf16.msra.mxu1 %v1465_v44 }
 0x1df   : > { %1087 = vmatprep.subr.bf16.mxu1 %v1597_v0 }
 0x1e2   : > { %1088 = vmatpush1.bf16.msra.mxu1 %v1466_v45 }
 0x1e3   : > { %1089 = vmatprep.subr.bf16.mxu1 %v1597_v0 }
 0x1e6   : > { %1090 = vmatpush1.bf16.msra.mxu1 %v1467_v46 }
 0x1e7   : > { %1091 = vmatprep.subr.bf16.mxu1 %v1597_v0 }
 0x1ea   : > { %1092 = vmatpush1.bf16.msra.mxu1 %v1468_v47 }
 0x1eb   : > { %1093 = vmatprep.subr.bf16.mxu1 %v1597_v0 }
 0x1ee   : > { %1094 = vmatpush1.bf16.msra.mxu1 %v1469_v49 }
 0x1ef   : > { %1109 = vmatprep.subr.bf16.mxu1 %v1597_v0 }
 0x1f2   : > { %1110 = vmatpush2.bf16.msra.mxu1 %v1470_v53 }
 0x1f5   : > { %1112 = vmatmul.mubr.bf16.vlgmr.msra.gmra.mxu1 %v1017_v56 }
 0x28a   : > { %v977_v57 = vpop.f32.mrf.mxu0 }
 0x28c   : > { %v979_v58 = vpop.f32.mrf.mxu0 }
 0x28e   : > { %v980_v59 = vpop.f32.mrf.mxu0 }
 0x290   : > { %v982_v60 = vpop.f32.mrf.mxu0 }
 0x291   : > { %v879_v61 = vpop.f32.mrf.mxu1 }
 0x292   : > { %v978_v2 = vadd.f32 %v977_v57, %v879_v61 }
 0x293   : > { %v881_v62 = vpop.f32.mrf.mxu1 }
 0x295   : > { %v882_v63 = vpop.f32.mrf.mxu1 }
 0x296   : > { %v981_v7 = vadd.f32 %v980_v59, %v882_v63 }
 0x297   : > { %v884_v1 = vpop.f32.mrf.mxu1 }
 0x2b5   : > { %v1113_v0 = vpop.f32.mrf.mxu1 }
 0x2b6   : > { %v1120_v4 = vadd.f32 %v1113_v0, %v978_v2 }
 0x2b7   : > { %v1115_v5 = vpop.f32.mrf.mxu1 }
 0x2b8   : > { %v1135_v8 = vadd.f32 %v1342_v3, %v1120_v4 }
 0x2b9   : > { %v1116_v11 = vpop.f32.mrf.mxu1 }
 0x2ba   : > { %v1167_v12 = vadd.f32 %v1163_v6, %v1135_v8  ;;  %v1121_v14 = vadd.f32 %v1116_v11, %v981_v7 }
 0x2bb   : > { %v1118_v15 = vpop.f32.mrf.mxu1 }
 0x2bc   : > { %v1169_v17 = vmax.f32 %v1167_v12, 0.0  ;;  %v1136_v18 = vadd.f32 %v1342_v3, %v1121_v14 }
 0x2be   : > { %1171 = vst [vmem:[%s247_s16] sm:$0xff] %v1169_v17  ;;  %v1168_v20 = vadd.f32 %v1164_v16, %v1136_v18 }
 0x2c0   : > { %v1170_v21 = vmax.f32 %v1168_v20, 0.0 }
 0x2c2   : > { %1172 = vst [vmem:[%s247_s16 + $0x8] sm:$0xff] %v1170_v21 }
 0x2c3   : > { %1536 = shalt.err (!%p1533_p3)
}
 0x2c4   : > { %s1537_s11 = scalar_lea.hbm %s1849_s30, 256  ;;  %s1541_s14 = scalar_lea.hbm %s1897_s5, 512 }
 0x2c5   : > { %p1538_p2 = scmp.ne.s32.totalorder %s1849_s30, %s1537_s11  ;;  %p1542_p7 = scmp.lt.s32.totalorder %s1849_s30, %s1897_s5 }
 0x2c6   : > { %p1543_p6 = scmp.lt.s32.totalorder %s1541_s14, %s1537_s11 }
 0x2c7   : > { %p1539_p4 = pnand %p1538_p2, %p1671_p5 }
 0x2c8   : > { %p1544_p9 = por %p1543_p6, %p1542_p7 }
 0x2c9   : > { %p1540_p13 = pneg %p1539_p4 }
 0x2cb   : > { %p1545_p10 = pnand %p1544_p9, %p1540_p13 }
 0x2cd   : > { %1548 = shalt.err (!%p1545_p10)
}
 0x2ce   : > { %s1602_s23 = smov 128  }
 0x2cf   : > { %1358 = dma.vmem_to_hbm [thread:$0]  (%p1671_p5), %s1844_s17, 256, %s1849_s30, %s1851_s6, %s1602_s23, %s1602_s23, %s1599_s10  }
 0x2d0 PF: > { %p1375_p12 = scmp.ge.s32.totalorder %s1591_s21, 2  ;;  %s1202_s25 = sand.u32 1, %s1579_s18  }
 0x2d1   : > { %p1907_p8 = scmp.ne.s32.totalorder %s1900_s29, 0  ;;  %s1203_s26 = scalar_lea.sflag [#allocation5], %s1202_s25 }
 0x2d3   : > { %p1368_p11 = pnand %p1375_p12, %p1907_p8 }
 0x2d5   : > { %p1369_p0 = pneg %p1368_p11 }
 0x2d7   : > { %1574 = dma.done.wait (%p1369_p0), %s1203_s26, 256  }
 0x2d8   : > { %1576 = vsyncadd (%p1369_p0), %s1203_s26, 4294967040  ;;  %p17_p1 = scmp.ge.s32.totalorder %s1658_s24, 4   ;;  %s1908_s18 = smov %s1583_s19 }
 0x2d9   : > { %s1909_s19 = smov %s1587_s20  ;;  %s1910_s20 = smov %s1669_s27 }
 0x2da   : > { %s1911_s21 = smov %s1658_s24  ;;  %19 = sbr.rel (!%p17_p1) target bundleno = 5 (0x5), region = 88 }
 0x2df   :  { %1208 = vsyncpa [#allocation4], 1 }
 0x2e0   :  { %1210 = vsyncpa [#allocation4 + $0x1], 1 }
 0x2e1   :  { %1211 = vsyncpa [#allocation7], 1 }
 0x2e2   :  { %1212 = vsyncpa [#allocation5], 1 }
 0x2e3   :  { %1214 = vsyncpa [#allocation5 + $0x1], 1 }

</bundles_post_ra>
